<compile_context>
chip_gen: v5e
topology: v5e:2x2
jax: 0.10.0
libtpu: 0.0.40
codegen_flags: <defaults>
</compile_context>

<pallas_src>
import math

import jax
import jax.numpy as jnp
from jax.experimental import pallas as pl
from jax.experimental.pallas import tpu as pltpu

HID = 32


def autoencoder_kernel(x_ref, w1_ref, b1_ref, w23_ref, b23_ref, w4_ref, b4_ref, o_ref):
    x = x_ref[...]

    # encoder Linear(D,32) + ReLU
    h1 = jnp.dot(x, w1_ref[...], preferred_element_type=jnp.float32) + b1_ref[...]
    h1 = jnp.maximum(h1, 0.0)

    # fused encoder Linear(32,2) @ decoder Linear(2,32), then ReLU
    h2 = jnp.dot(h1, w23_ref[...], preferred_element_type=jnp.float32) + b23_ref[...]
    h2 = jnp.maximum(h2, 0.0)

    # decoder Linear(32,D)
    out = jnp.dot(h2, w4_ref[...], preferred_element_type=jnp.float32) + b4_ref[...]
    o_ref[...] = out.astype(o_ref.dtype)


def _ceil_div(a, b):
    return -(-a // b)


def _round_up(a, m):
    return _ceil_div(a, m) * m


def _vmem_limit_bytes():
    """Per-generation scoped-VMEM budget: ~3/4 of physical VMEM.

    v5e/v6e (128 MiB physical) -> ~96 MiB; v7x (64 MiB per TensorCore) -> 48 MiB.
    Falls back to the smallest generation's budget if the query is unavailable.
    """
    phys = None
    try:
        phys = getattr(pltpu.get_tpu_info(), "vmem_capacity_bytes", None)
    except Exception:
        phys = None
    if not phys:
        phys = 64 * 1024 * 1024  # conservative fallback = v7x per-TC VMEM
    return max(32 << 20, min(int(phys) * 3 // 4, 112 << 20))


def _choose_batch_tile(B, D, vmem_limit, weight_bytes):
    """Largest batch tile that fits VMEM, shaped so the grid has >=2 (even) steps."""
    bytes_per_row = 2 * 2 * D * 4                      # (x + out) x 2 buffers x f32
    # Budget weights at 2 buffers (in case single-buffering is unavailable) + 1 MiB slack.
    avail = vmem_limit - 2 * weight_bytes - (1 << 20)
    tb = max(8, avail // bytes_per_row)
    if tb >= B:
        if B > 8:
            # Split into at least two tiles so v7x can keep both TensorCores busy.
            tb = min(B, _round_up(_ceil_div(B, 2), 8))
        else:
            tb = B                                      # single full-extent block
    else:
        tb = (tb // 8) * 8                              # (8,128) sublane constraint
    nb = _ceil_div(B, tb)
    if nb > 2 and nb % 2 == 1:
        # Nudge toward an even step count (balanced across v7x's two cores).
        tb_even = max(8, _round_up(_ceil_div(B, nb + 1), 8))
        if tb_even < B and _ceil_div(B, tb_even) % 2 == 0:
            tb, nb = tb_even, _ceil_div(B, tb_even)
    return tb, nb


def autoencoder2d_forward(x, params):
    """x: [B, D] float32; params: dict of pre-transposed weights/biases ([in, out])."""
    B, D = x.shape
    w1, b1 = params["w1"], params["b1"]
    w2, b2 = params["w2"], params["b2"]
    w3, b3 = params["w3"], params["b3"]
    w4, b4 = params["w4"], params["b4"]

    # Fuse the two bottleneck linears (no activation between them; z is not returned).
    w23 = w2 @ w3                  # [32, 32]
    b23 = b2 @ w3 + b3             # [1, 32]

    weight_bytes = 4 * (w1.size + b1.size + w23.size + b23.size + w4.size + b4.size)
    vmem_limit = _vmem_limit_bytes()
    tb, nb = _choose_batch_tile(B, D, vmem_limit, weight_bytes)

    cost = pl.CostEstimate(
        flops=2 * B * (D * HID + HID * HID + HID * D),
        transcendentals=0,
        bytes_accessed=2 * B * D * 4 + weight_bytes,
    )

    stream = lambda i: (i, 0)      # x / out tiles walk the batch axis
    const = lambda i: (0, 0)       # weights/biases stay VMEM-resident across steps

    def call(weight_mode):
        wkw = {} if weight_mode is None else {"pipeline_mode": weight_mode}
        return pl.pallas_call(
            autoencoder_kernel,
            out_shape=jax.ShapeDtypeStruct((B, D), jnp.float32),
            grid=(nb,),
            in_specs=[
                pl.BlockSpec((tb, D), stream),            # x tile (streamed, full rows)
                pl.BlockSpec((D, HID), const, **wkw),     # w1
                pl.BlockSpec((1, HID), const, **wkw),     # b1
                pl.BlockSpec((HID, HID), const, **wkw),   # w23 (fused)
                pl.BlockSpec((1, HID), const, **wkw),     # b23 (fused)
                pl.BlockSpec((HID, D), const, **wkw),     # w4
                pl.BlockSpec((1, D), const, **wkw),       # b4
            ],
            out_specs=pl.BlockSpec((tb, D), stream),
            compiler_params=pltpu.CompilerParams(
                dimension_semantics=("parallel",),        # v7x: shard batch steps over both TCs
                vmem_limit_bytes=vmem_limit,
            ),
            cost_estimate=cost,
        )(x, w1, b1, w23, b23, w4, b4)

    try:
        # Constant-index weight blocks never change; one VMEM buffer suffices.
        return jax.block_until_ready(call(pl.Buffered(1)))
    except Exception:
        # pipeline_mode=Buffered(1) unsupported on this JAX build: fall back to the
        # default buffering (already accounted for in the tb budget above).
        return call(None)


def init_params(key, input_dim):
    """PyTorch-style init: U(-1/sqrt(fan_in), 1/sqrt(fan_in)); weights stored [in, out]."""
    def linear(key, fan_in, fan_out):
        kw, kb = jax.random.split(key)
        bound = 1.0 / math.sqrt(fan_in)
        w = jax.random.uniform(kw, (fan_in, fan_out), jnp.float32, -bound, bound)
        b = jax.random.uniform(kb, (1, fan_out), jnp.float32, -bound, bound)
        return w, b

    k1, k2, k3, k4 = jax.random.split(key, 4)
    w1, b1 = linear(k1, input_dim, 32)   # encoder[0]
    w2, b2 = linear(k2, 32, 2)           # encoder[2]
    w3, b3 = linear(k3, 2, 32)           # decoder[0]
    w4, b4 = linear(k4, 32, input_dim)   # decoder[2]
    return dict(w1=w1, b1=b1, w2=w2, b2=b2, w3=w3, b3=b3, w4=w4, b4=b4)


def reference_forward(x, p):
    # Un-fused reference, matching the PyTorch module op-for-op.
    h1 = jnp.maximum(x @ p["w1"] + p["b1"], 0.0)
    z = h1 @ p["w2"] + p["b2"]
    h2 = jnp.maximum(z @ p["w3"] + p["b3"], 0.0)
    return h2 @ p["w4"] + p["b4"]


if __name__ == "__main__":
    key = jax.random.PRNGKey(0)
    k_params, k_x = jax.random.split(key)

    input_dim = 16
    params = init_params(k_params, input_dim)

    # batch=8: single full-extent tile.  batch=12: non-divisible B exercises the
    # masked partial last tile (valid rows must be unaffected by the OOB rows).
    for batch in (8, 12):
        x = jax.random.normal(jax.random.fold_in(k_x, batch), (batch, input_dim), jnp.float32)
        out = jax.block_until_ready(autoencoder2d_forward(x, params))
        ref = reference_forward(x, params)
        assert out.shape == (batch, input_dim)
        # Fused w2@w3 reassociates fp ops; allow a slightly looser tolerance.
        assert jnp.allclose(out, ref, atol=2e-5, rtol=2e-5), f"mismatch vs reference (B={batch})"

    print("KERNEL_OK")
</pallas_src>

<mosaic_0001>
module attributes {stable_mosaic.version = 11 : i64} {
  func.func @autoencoder_kernel(%arg0: i32, %arg1: memref<8x16xf32, #tpu.memory_space<vmem>>, %arg2: memref<16x32xf32, #tpu.memory_space<vmem>>, %arg3: memref<1x32xf32, #tpu.memory_space<vmem>>, %arg4: memref<32x32xf32, #tpu.memory_space<vmem>>, %arg5: memref<1x32xf32, #tpu.memory_space<vmem>>, %arg6: memref<32x16xf32, #tpu.memory_space<vmem>>, %arg7: memref<1x16xf32, #tpu.memory_space<vmem>>, %arg8: memref<8x16xf32, #tpu.memory_space<vmem>>) attributes {dimension_semantics = [#tpu.dimension_semantics<parallel>], iteration_bounds = array<i64: 1>, scalar_prefetch = 0 : i64, scratch_operands = 0 : i64, tpu.core_type = #tpu.core_type<tc>, window_params = [{transform_indices = @transform_0, window_bounds = array<i64: 8, 16>}, {pipeline_mode = #tpu.pipeline_mode<synchronous>, transform_indices = @transform_1, window_bounds = array<i64: 16, 32>}, {pipeline_mode = #tpu.pipeline_mode<synchronous>, transform_indices = @transform_2, window_bounds = array<i64: 1, 32>}, {pipeline_mode = #tpu.pipeline_mode<synchronous>, transform_indices = @transform_3, window_bounds = array<i64: 32, 32>}, {pipeline_mode = #tpu.pipeline_mode<synchronous>, transform_indices = @transform_4, window_bounds = array<i64: 1, 32>}, {pipeline_mode = #tpu.pipeline_mode<synchronous>, transform_indices = @transform_5, window_bounds = array<i64: 32, 16>}, {pipeline_mode = #tpu.pipeline_mode<synchronous>, transform_indices = @transform_6, window_bounds = array<i64: 1, 16>}, {transform_indices = @transform_7, window_bounds = array<i64: 8, 16>}]} {
    %c0 = arith.constant 0 : index
    %c0_0 = arith.constant 0 : index
    %0 = vector.load %arg1[%c0, %c0_0] : memref<8x16xf32, #tpu.memory_space<vmem>>, vector<8x16xf32>
    %c0_1 = arith.constant 0 : index
    %c0_2 = arith.constant 0 : index
    %1 = vector.load %arg2[%c0_1, %c0_2] : memref<16x32xf32, #tpu.memory_space<vmem>>, vector<16x32xf32>
    %cst = arith.constant dense<0.000000e+00> : vector<8x32xf32>
    %2 = tpu.matmul %0, %1, %cst {dimension_numbers = #tpu.dot_dimension_numbers<[1], [0], [0], [1], [0, 0, 1, 1], [], []>} : vector<8x16xf32>, vector<16x32xf32>, vector<8x32xf32> -> vector<8x32xf32>
    %c0_3 = arith.constant 0 : index
    %c0_4 = arith.constant 0 : index
    %3 = vector.load %arg3[%c0_3, %c0_4] : memref<1x32xf32, #tpu.memory_space<vmem>>, vector<1x32xf32>
    %4 = vector.broadcast %3 : vector<1x32xf32> to vector<8x32xf32>
    %5 = arith.addf %2, %4 : vector<8x32xf32>
    %cst_5 = arith.constant 0.000000e+00 : f32
    %6 = vector.broadcast %cst_5 : f32 to vector<8x32xf32>
    %7 = arith.maximumf %5, %6 : vector<8x32xf32>
    %c0_6 = arith.constant 0 : index
    %c0_7 = arith.constant 0 : index
    %8 = vector.load %arg4[%c0_6, %c0_7] : memref<32x32xf32, #tpu.memory_space<vmem>>, vector<32x32xf32>
    %cst_8 = arith.constant dense<0.000000e+00> : vector<8x32xf32>
    %9 = tpu.matmul %7, %8, %cst_8 {dimension_numbers = #tpu.dot_dimension_numbers<[1], [0], [0], [1], [0, 0, 1, 1], [], []>} : vector<8x32xf32>, vector<32x32xf32>, vector<8x32xf32> -> vector<8x32xf32>
    %c0_9 = arith.constant 0 : index
    %c0_10 = arith.constant 0 : index
    %10 = vector.load %arg5[%c0_9, %c0_10] : memref<1x32xf32, #tpu.memory_space<vmem>>, vector<1x32xf32>
    %11 = vector.broadcast %10 : vector<1x32xf32> to vector<8x32xf32>
    %12 = arith.addf %9, %11 : vector<8x32xf32>
    %cst_11 = arith.constant 0.000000e+00 : f32
    %13 = vector.broadcast %cst_11 : f32 to vector<8x32xf32>
    %14 = arith.maximumf %12, %13 : vector<8x32xf32>
    %c0_12 = arith.constant 0 : index
    %c0_13 = arith.constant 0 : index
    %15 = vector.load %arg6[%c0_12, %c0_13] : memref<32x16xf32, #tpu.memory_space<vmem>>, vector<32x16xf32>
    %cst_14 = arith.constant dense<0.000000e+00> : vector<8x16xf32>
    %16 = tpu.matmul %14, %15, %cst_14 {dimension_numbers = #tpu.dot_dimension_numbers<[1], [0], [0], [1], [0, 0, 1, 1], [], []>} : vector<8x32xf32>, vector<32x16xf32>, vector<8x16xf32> -> vector<8x16xf32>
    %c0_15 = arith.constant 0 : index
    %c0_16 = arith.constant 0 : index
    %17 = vector.load %arg7[%c0_15, %c0_16] : memref<1x16xf32, #tpu.memory_space<vmem>>, vector<1x16xf32>
    %18 = vector.broadcast %17 : vector<1x16xf32> to vector<8x16xf32>
    %19 = arith.addf %16, %18 : vector<8x16xf32>
    %c0_17 = arith.constant 0 : index
    %c0_18 = arith.constant 0 : index
    %20 = vector.load %arg8[%c0_17, %c0_18] : memref<8x16xf32, #tpu.memory_space<vmem>>, vector<8x16xf32>
    tpu.vector_store %arg8[%c0_17, %c0_18], %19 {strides = array<i32>} : memref<8x16xf32, #tpu.memory_space<vmem>>, vector<8x16xf32>,
    return
  }
  func.func @transform_0(%arg0: i32) -> (i32, i32) {
    %c0_i32 = arith.constant 0 : i32
    %c0_i32_0 = arith.constant 0 : i32
    return %arg0, %c0_i32 : i32, i32
  }
  func.func @transform_1(%arg0: i32) -> (i32, i32) {
    %c0_i32 = arith.constant 0 : i32
    %c0_i32_0 = arith.constant 0 : i32
    %c0_i32_1 = arith.constant 0 : i32
    return %c0_i32, %c0_i32_0 : i32, i32
  }
  func.func @transform_2(%arg0: i32) -> (i32, i32) {
    %c0_i32 = arith.constant 0 : i32
    %c0_i32_0 = arith.constant 0 : i32
    %c0_i32_1 = arith.constant 0 : i32
    return %c0_i32, %c0_i32_0 : i32, i32
  }
  func.func @transform_3(%arg0: i32) -> (i32, i32) {
    %c0_i32 = arith.constant 0 : i32
    %c0_i32_0 = arith.constant 0 : i32
    %c0_i32_1 = arith.constant 0 : i32
    return %c0_i32, %c0_i32_0 : i32, i32
  }
  func.func @transform_4(%arg0: i32) -> (i32, i32) {
    %c0_i32 = arith.constant 0 : i32
    %c0_i32_0 = arith.constant 0 : i32
    %c0_i32_1 = arith.constant 0 : i32
    return %c0_i32, %c0_i32_0 : i32, i32
  }
  func.func @transform_5(%arg0: i32) -> (i32, i32) {
    %c0_i32 = arith.constant 0 : i32
    %c0_i32_0 = arith.constant 0 : i32
    %c0_i32_1 = arith.constant 0 : i32
    return %c0_i32, %c0_i32_0 : i32, i32
  }
  func.func @transform_6(%arg0: i32) -> (i32, i32) {
    %c0_i32 = arith.constant 0 : i32
    %c0_i32_0 = arith.constant 0 : i32
    %c0_i32_1 = arith.constant 0 : i32
    return %c0_i32, %c0_i32_0 : i32, i32
  }
  func.func @transform_7(%arg0: i32) -> (i32, i32) {
    %c0_i32 = arith.constant 0 : i32
    %c0_i32_0 = arith.constant 0 : i32
    return %arg0, %c0_i32 : i32, i32
  }
}

module attributes {stable_mosaic.version = 11 : i64} {
  func.func @autoencoder_kernel(%arg0: i32, %arg1: memref<8x16xf32, #tpu.memory_space<vmem>>, %arg2: memref<16x32xf32, #tpu.memory_space<vmem>>, %arg3: memref<1x32xf32, #tpu.memory_space<vmem>>, %arg4: memref<32x32xf32, #tpu.memory_space<vmem>>, %arg5: memref<1x32xf32, #tpu.memory_space<vmem>>, %arg6: memref<32x16xf32, #tpu.memory_space<vmem>>, %arg7: memref<1x16xf32, #tpu.memory_space<vmem>>, %arg8: memref<8x16xf32, #tpu.memory_space<vmem>>) attributes {dimension_semantics = [#tpu.dimension_semantics<parallel>], iteration_bounds = array<i64: 1>, scalar_prefetch = 0 : i64, scratch_operands = 0 : i64, tpu.core_type = #tpu.core_type<tc>, window_params = [{transform_indices = @transform_0, window_bounds = array<i64: 8, 16>}, {pipeline_mode = #tpu.pipeline_mode<synchronous>, transform_indices = @transform_1, window_bounds = array<i64: 16, 32>}, {pipeline_mode = #tpu.pipeline_mode<synchronous>, transform_indices = @transform_2, window_bounds = array<i64: 1, 32>}, {pipeline_mode = #tpu.pipeline_mode<synchronous>, transform_indices = @transform_3, window_bounds = array<i64: 32, 32>}, {pipeline_mode = #tpu.pipeline_mode<synchronous>, transform_indices = @transform_4, window_bounds = array<i64: 1, 32>}, {pipeline_mode = #tpu.pipeline_mode<synchronous>, transform_indices = @transform_5, window_bounds = array<i64: 32, 16>}, {pipeline_mode = #tpu.pipeline_mode<synchronous>, transform_indices = @transform_6, window_bounds = array<i64: 1, 16>}, {transform_indices = @transform_7, window_bounds = array<i64: 8, 16>}]} {
    %c0 = arith.constant 0 : index
    %c0_0 = arith.constant 0 : index
    %0 = vector.load %arg1[%c0, %c0_0] : memref<8x16xf32, #tpu.memory_space<vmem>>, vector<8x16xf32>
    %c0_1 = arith.constant 0 : index
    %c0_2 = arith.constant 0 : index
    %1 = vector.load %arg2[%c0_1, %c0_2] : memref<16x32xf32, #tpu.memory_space<vmem>>, vector<16x32xf32>
    %cst = arith.constant dense<0.000000e+00> : vector<8x32xf32>
    %2 = tpu.matmul %0, %1, %cst {dimension_numbers = #tpu.dot_dimension_numbers<[1], [0], [0], [1], [0, 0, 1, 1], [], []>} : vector<8x16xf32>, vector<16x32xf32>, vector<8x32xf32> -> vector<8x32xf32>
    %c0_3 = arith.constant 0 : index
    %c0_4 = arith.constant 0 : index
    %3 = vector.load %arg3[%c0_3, %c0_4] : memref<1x32xf32, #tpu.memory_space<vmem>>, vector<1x32xf32>
    %4 = vector.broadcast %3 : vector<1x32xf32> to vector<8x32xf32>
    %5 = arith.addf %2, %4 : vector<8x32xf32>
    %cst_5 = arith.constant 0.000000e+00 : f32
    %6 = vector.broadcast %cst_5 : f32 to vector<8x32xf32>
    %7 = arith.maximumf %5, %6 : vector<8x32xf32>
    %c0_6 = arith.constant 0 : index
    %c0_7 = arith.constant 0 : index
    %8 = vector.load %arg4[%c0_6, %c0_7] : memref<32x32xf32, #tpu.memory_space<vmem>>, vector<32x32xf32>
    %cst_8 = arith.constant dense<0.000000e+00> : vector<8x32xf32>
    %9 = tpu.matmul %7, %8, %cst_8 {dimension_numbers = #tpu.dot_dimension_numbers<[1], [0], [0], [1], [0, 0, 1, 1], [], []>} : vector<8x32xf32>, vector<32x32xf32>, vector<8x32xf32> -> vector<8x32xf32>
    %c0_9 = arith.constant 0 : index
    %c0_10 = arith.constant 0 : index
    %10 = vector.load %arg5[%c0_9, %c0_10] : memref<1x32xf32, #tpu.memory_space<vmem>>, vector<1x32xf32>
    %11 = vector.broadcast %10 : vector<1x32xf32> to vector<8x32xf32>
    %12 = arith.addf %9, %11 : vector<8x32xf32>
    %cst_11 = arith.constant 0.000000e+00 : f32
    %13 = vector.broadcast %cst_11 : f32 to vector<8x32xf32>
    %14 = arith.maximumf %12, %13 : vector<8x32xf32>
    %c0_12 = arith.constant 0 : index
    %c0_13 = arith.constant 0 : index
    %15 = vector.load %arg6[%c0_12, %c0_13] : memref<32x16xf32, #tpu.memory_space<vmem>>, vector<32x16xf32>
    %cst_14 = arith.constant dense<0.000000e+00> : vector<8x16xf32>
    %16 = tpu.matmul %14, %15, %cst_14 {dimension_numbers = #tpu.dot_dimension_numbers<[1], [0], [0], [1], [0, 0, 1, 1], [], []>} : vector<8x32xf32>, vector<32x16xf32>, vector<8x16xf32> -> vector<8x16xf32>
    %c0_15 = arith.constant 0 : index
    %c0_16 = arith.constant 0 : index
    %17 = vector.load %arg7[%c0_15, %c0_16] : memref<1x16xf32, #tpu.memory_space<vmem>>, vector<1x16xf32>
    %18 = vector.broadcast %17 : vector<1x16xf32> to vector<8x16xf32>
    %19 = arith.addf %16, %18 : vector<8x16xf32>
    %c0_17 = arith.constant 0 : index
    %c0_18 = arith.constant 0 : index
    %20 = vector.load %arg8[%c0_17, %c0_18] : memref<8x16xf32, #tpu.memory_space<vmem>>, vector<8x16xf32>
    tpu.vector_store %arg8[%c0_17, %c0_18], %19 {strides = array<i32>} : memref<8x16xf32, #tpu.memory_space<vmem>>, vector<8x16xf32>,
    return
  }
  func.func @transform_0(%arg0: i32) -> (i32, i32) {
    %c0_i32 = arith.constant 0 : i32
    %c0_i32_0 = arith.constant 0 : i32
    return %arg0, %c0_i32 : i32, i32
  }
  func.func @transform_1(%arg0: i32) -> (i32, i32) {
    %c0_i32 = arith.constant 0 : i32
    %c0_i32_0 = arith.constant 0 : i32
    %c0_i32_1 = arith.constant 0 : i32
    return %c0_i32, %c0_i32_0 : i32, i32
  }
  func.func @transform_2(%arg0: i32) -> (i32, i32) {
    %c0_i32 = arith.constant 0 : i32
    %c0_i32_0 = arith.constant 0 : i32
    %c0_i32_1 = arith.constant 0 : i32
    return %c0_i32, %c0_i32_0 : i32, i32
  }
  func.func @transform_3(%arg0: i32) -> (i32, i32) {
    %c0_i32 = arith.constant 0 : i32
    %c0_i32_0 = arith.constant 0 : i32
    %c0_i32_1 = arith.constant 0 : i32
    return %c0_i32, %c0_i32_0 : i32, i32
  }
  func.func @transform_4(%arg0: i32) -> (i32, i32) {
    %c0_i32 = arith.constant 0 : i32
    %c0_i32_0 = arith.constant 0 : i32
    %c0_i32_1 = arith.constant 0 : i32
    return %c0_i32, %c0_i32_0 : i32, i32
  }
  func.func @transform_5(%arg0: i32) -> (i32, i32) {
    %c0_i32 = arith.constant 0 : i32
    %c0_i32_0 = arith.constant 0 : i32
    %c0_i32_1 = arith.constant 0 : i32
    return %c0_i32, %c0_i32_0 : i32, i32
  }
  func.func @transform_6(%arg0: i32) -> (i32, i32) {
    %c0_i32 = arith.constant 0 : i32
    %c0_i32_0 = arith.constant 0 : i32
    %c0_i32_1 = arith.constant 0 : i32
    return %c0_i32, %c0_i32_0 : i32, i32
  }
  func.func @transform_7(%arg0: i32) -> (i32, i32) {
    %c0_i32 = arith.constant 0 : i32
    %c0_i32_0 = arith.constant 0 : i32
    return %arg0, %c0_i32 : i32, i32
  }
}

</mosaic_0001>

<bundles_post_ra>
// kernel: tpu_custom_call.1
= control target key start
LH: loop header
LB: loop body
LE: loop exit
PB: predicated region body
PF: predicated region fallthrough
CT: control target
= control target key end

     0   :  { %12 = vsyncpa [#allocation3], 0  ;;  %s304_s0 = inlined_call_operand.hbm [shape: f32[8,16], index: 0, kind: input, shape index: {}]   ;;  %s305_s1 = inlined_call_operand.vmem [shape: f32[16,32], index: 1, kind: input, shape index: {}]   ;;  %s306_s2 = inlined_call_operand.vmem [shape: f32[1,32], index: 2, kind: input, shape index: {}]   ;;  %s307_s3 = inlined_call_operand.vmem [shape: f32[32,32], index: 3, kind: input, shape index: {}]   ;;  %s308_s4 = inlined_call_operand.vmem [shape: f32[1,32], index: 4, kind: input, shape index: {}]   ;;  %s309_s5 = inlined_call_operand.vmem [shape: f32[32,16], index: 5, kind: input, shape index: {}]   ;;  %s310_s6 = inlined_call_operand.vmem [shape: f32[1,16], index: 6, kind: input, shape index: {}]   ;;  %s311_s7 = inlined_call_operand.hbm [shape: f32[8,16], index: 7, kind: output, shape index: {}]  }
   0x1   :  { %13 = vsyncpa [#allocation4], 0  ;;  %s19_s26 = sshll.u32 %s304_s0, 4  ;;  %s215_s27 = smov [#allocation2]   ;;  %s20_s26 = int_to_ptr.hbm [resolvable:$true] %s19_s26 }
   0x2   :  { %s21_s28 = sshll.u32 %s215_s27, 4  ;;  %s22_s28 = int_to_ptr.vmem [resolvable:$true] %s21_s28 }
   0x3   :  { %24 = dma.hbm_to_vmem [thread:$0]  %s20_s26, 128, %s22_s28, [#allocation3]  }
   0x4   :  { %211 = dma.done.wait [#allocation3], 128  }
   0x5   :  { %212 = vsyncadd [#allocation3], 4294967168  ;;  %v43_v0 = vld [vmem:[%s305_s1 + $0x8] sm:$0xff]  ;;  %v42_v1 = vld [vmem:[%s305_s1] sm:$0xff]  ;;  %vm48_vm0 = vcmask 130048   ;;  %vm81_vm1 = vcmask 261120  }
   0x6   :  { %66 = vmatpush.msra.mxu0 %v43_v0  ;;  %v41_v2 = vld [vmem:[#allocation2] sm:$0xff]  ;;  %v76_v3 = vld [vmem:[%s307_s3 + $0x18] sm:$0xff]  ;;  %v75_v4 = vld [vmem:[%s307_s3 + $0x10] sm:$0xff]  ;;  %s216_s28 = smov [#allocation5]   ;;  %s145_s9 = sshll.u32 %s311_s7, 4  ;;  %s146_s9 = int_to_ptr.hbm [resolvable:$true] %s145_s9 }
   0x7   :  { %97 = vmatpush.msra.mxu1 %v76_v3  ;;  %v74_v5 = vld [vmem:[%s307_s3 + $0x8] sm:$0xff]  ;;  %v73_v6 = vld [vmem:[%s307_s3] sm:$0xff]  ;;  %v109_v7 = vld [vmem:[%s309_s5 + $0x18] sm:$0xff]  ;;  %s143_s29 = sshll.u32 %s216_s28, 4  ;;  %s144_s29 = int_to_ptr.vmem [resolvable:$true] %s143_s29 }
   0x8   :  { %67 = vmatpush.msra.mxu0 %v42_v1  ;;  %129 = vmatpush.msra.mxu2 %v109_v7  ;;  %v160_v8 = vld [vmem:[%s306_s2] ss:$0 sm:$0xff]  ;;  %v108_v12 = vld [vmem:[%s309_s5 + $0x10] sm:$0xff]  ;;  %v107_v13 = vld [vmem:[%s309_s5 + $0x8] sm:$0xff] }
   0x9   :  { %155 = vmatmul.msk.f32.vlgmr.msra.gmra.mxu0 %vm48_vm0, %v41_v2  ;;  %98 = vmatpush.msra.mxu1 %v75_v4  ;;  %v106_v14 = vld [vmem:[%s309_s5] sm:$0xff] }
   0xa   :  { %130 = vmatpush.msra.mxu2 %v108_v12  ;;  %v161_v15 = vld [vmem:[%s308_s4] ss:$0 sm:$0xff] }
   0xb   :  { %99 = vmatpush.msra.mxu1 %v74_v5  ;;  %v162_v19 = vld [vmem:[%s310_s6] ss:$0 sm:$0xff] }
   0xc   :  { %131 = vmatpush.msra.mxu2 %v107_v13 }
   0xd   :  { %100 = vmatpush.msra.mxu1 %v73_v6 }
   0xe   :  { %132 = vmatpush.msra.mxu2 %v106_v14 }
  0x86   :  { %v69_v9 = vpop.f32.mrf.mxu0 }
  0x87   :  { %v70_v10 = vadd.f32 %v160_v8, %v69_v9 }
  0x89   :  { %v72_v11 = vmax.f32 %v70_v10, 0.0 }
  0x8b   :  { %156 = vmatmul.msk.f32.vlgmr.msra.gmra.mxu1 %vm81_vm1, %v72_v11 }
 0x108   :  { %v102_v16 = vpop.f32.mrf.mxu1 }
 0x109   :  { %v103_v17 = vadd.f32 %v161_v15, %v102_v16 }
 0x10b   :  { %v105_v18 = vmax.f32 %v103_v17, 0.0 }
 0x10d   :  { %157 = vmatmul.msk.f32.vlgmr.msra.gmra.mxu2 %vm81_vm1, %v105_v18 }
 0x190   :  { %v134_v20 = vpop.f32.mrf.mxu2 }
 0x191   :  { %v135_v21 = vadd.f32 %v162_v19, %v134_v20 }
 0x193   :  { %137 = vst.msk [vmem:[#allocation5] sm:$0xff] %vm48_vm0, %v135_v21 }
 0x194   :  { %148 = dma.vmem_to_hbm [thread:$0]  %s144_s29, 128, %s146_s9, [#allocation4]  }
 0x195   :  { %213 = dma.done.wait [#allocation4], 128  }
 0x196   :  { %214 = vsyncadd [#allocation4], 4294967168 }
 0x197   :  { %153 = vsyncpa [#allocation3], 1 }
 0x198   :  { %154 = vsyncpa [#allocation4], 1 }

// kernel: tpu_custom_call.1
= control target key start
LH: loop header
LB: loop body
LE: loop exit
PB: predicated region body
PF: predicated region fallthrough
CT: control target
= control target key end

     0   :  { %12 = vsyncpa [#allocation3], 0  ;;  %s304_s0 = inlined_call_operand.hbm [shape: f32[8,16], index: 0, kind: input, shape index: {}]   ;;  %s305_s1 = inlined_call_operand.vmem [shape: f32[16,32], index: 1, kind: input, shape index: {}]   ;;  %s306_s2 = inlined_call_operand.vmem [shape: f32[1,32], index: 2, kind: input, shape index: {}]   ;;  %s307_s3 = inlined_call_operand.vmem [shape: f32[32,32], index: 3, kind: input, shape index: {}]   ;;  %s308_s4 = inlined_call_operand.vmem [shape: f32[1,32], index: 4, kind: input, shape index: {}]   ;;  %s309_s5 = inlined_call_operand.vmem [shape: f32[32,16], index: 5, kind: input, shape index: {}]   ;;  %s310_s6 = inlined_call_operand.vmem [shape: f32[1,16], index: 6, kind: input, shape index: {}]   ;;  %s311_s7 = inlined_call_operand.hbm [shape: f32[8,16], index: 7, kind: output, shape index: {}]  }
   0x1   :  { %13 = vsyncpa [#allocation4], 0  ;;  %s19_s26 = sshll.u32 %s304_s0, 4  ;;  %s215_s27 = smov [#allocation2]   ;;  %s20_s26 = int_to_ptr.hbm [resolvable:$true] %s19_s26 }
   0x2   :  { %s21_s28 = sshll.u32 %s215_s27, 4  ;;  %s22_s28 = int_to_ptr.vmem [resolvable:$true] %s21_s28 }
   0x3   :  { %24 = dma.hbm_to_vmem [thread:$0]  %s20_s26, 128, %s22_s28, [#allocation3]  }
   0x4   :  { %211 = dma.done.wait [#allocation3], 128  }
   0x5   :  { %212 = vsyncadd [#allocation3], 4294967168  ;;  %v43_v0 = vld [vmem:[%s305_s1 + $0x8] sm:$0xff]  ;;  %v42_v1 = vld [vmem:[%s305_s1] sm:$0xff]  ;;  %vm48_vm0 = vcmask 130048   ;;  %vm81_vm1 = vcmask 261120  }
   0x6   :  { %66 = vmatpush.msra.mxu0 %v43_v0  ;;  %v41_v2 = vld [vmem:[#allocation2] sm:$0xff]  ;;  %v76_v3 = vld [vmem:[%s307_s3 + $0x18] sm:$0xff]  ;;  %v75_v4 = vld [vmem:[%s307_s3 + $0x10] sm:$0xff]  ;;  %s216_s28 = smov [#allocation5]   ;;  %s145_s9 = sshll.u32 %s311_s7, 4  ;;  %s146_s9 = int_to_ptr.hbm [resolvable:$true] %s145_s9 }
   0x7   :  { %97 = vmatpush.msra.mxu1 %v76_v3  ;;  %v74_v5 = vld [vmem:[%s307_s3 + $0x8] sm:$0xff]  ;;  %v73_v6 = vld [vmem:[%s307_s3] sm:$0xff]  ;;  %v109_v7 = vld [vmem:[%s309_s5 + $0x18] sm:$0xff]  ;;  %s143_s29 = sshll.u32 %s216_s28, 4  ;;  %s144_s29 = int_to_ptr.vmem [resolvable:$true] %s143_s29 }
   0x8   :  { %67 = vmatpush.msra.mxu0 %v42_v1  ;;  %129 = vmatpush.msra.mxu2 %v109_v7  ;;  %v160_v8 = vld [vmem:[%s306_s2] ss:$0 sm:$0xff]  ;;  %v108_v12 = vld [vmem:[%s309_s5 + $0x10] sm:$0xff]  ;;  %v107_v13 = vld [vmem:[%s309_s5 + $0x8] sm:$0xff] }
   0x9   :  { %155 = vmatmul.msk.f32.vlgmr.msra.gmra.mxu0 %vm48_vm0, %v41_v2  ;;  %98 = vmatpush.msra.mxu1 %v75_v4  ;;  %v106_v14 = vld [vmem:[%s309_s5] sm:$0xff] }
   0xa   :  { %130 = vmatpush.msra.mxu2 %v108_v12  ;;  %v161_v15 = vld [vmem:[%s308_s4] ss:$0 sm:$0xff] }
   0xb   :  { %99 = vmatpush.msra.mxu1 %v74_v5  ;;  %v162_v19 = vld [vmem:[%s310_s6] ss:$0 sm:$0xff] }
   0xc   :  { %131 = vmatpush.msra.mxu2 %v107_v13 }
   0xd   :  { %100 = vmatpush.msra.mxu1 %v73_v6 }
   0xe   :  { %132 = vmatpush.msra.mxu2 %v106_v14 }
  0x86   :  { %v69_v9 = vpop.f32.mrf.mxu0 }
  0x87   :  { %v70_v10 = vadd.f32 %v160_v8, %v69_v9 }
  0x89   :  { %v72_v11 = vmax.f32 %v70_v10, 0.0 }
  0x8b   :  { %156 = vmatmul.msk.f32.vlgmr.msra.gmra.mxu1 %vm81_vm1, %v72_v11 }
 0x108   :  { %v102_v16 = vpop.f32.mrf.mxu1 }
 0x109   :  { %v103_v17 = vadd.f32 %v161_v15, %v102_v16 }
 0x10b   :  { %v105_v18 = vmax.f32 %v103_v17, 0.0 }
 0x10d   :  { %157 = vmatmul.msk.f32.vlgmr.msra.gmra.mxu2 %vm81_vm1, %v105_v18 }
 0x190   :  { %v134_v20 = vpop.f32.mrf.mxu2 }
 0x191   :  { %v135_v21 = vadd.f32 %v162_v19, %v134_v20 }
 0x193   :  { %137 = vst.msk [vmem:[#allocation5] sm:$0xff] %vm48_vm0, %v135_v21 }
 0x194   :  { %148 = dma.vmem_to_hbm [thread:$0]  %s144_s29, 128, %s146_s9, [#allocation4]  }
 0x195   :  { %213 = dma.done.wait [#allocation4], 128  }
 0x196   :  { %214 = vsyncadd [#allocation4], 4294967168 }
 0x197   :  { %153 = vsyncpa [#allocation3], 1 }
 0x198   :  { %154 = vsyncpa [#allocation4], 1 }

</bundles_post_ra>
